<compile_context>
chip_gen: v6e
topology: v6e:2x2x1
jax: 0.10.0
libtpu: 0.0.40
codegen_flags: <defaults>
</compile_context>

<pallas_src>
import functools
import math

import jax
import jax.numpy as jnp
from jax.experimental import pallas as pl
from jax.experimental.pallas import tpu as pltpu


def _onehot_kernel(t_ref, o_ref, *, n_classes, pack, c_tile, smooth):
    """t_ref: (TG, pack) int32 labels; o_ref: (TG, pack*c_tile) output block.

    A stored-row position p encodes (sub_row r, class c) as p = r*c_tile + c.
    On the packed path (pack > 1) c_tile == n_classes and the class grid axis
    has size 1; on the padded path (pack == 1) the class offset of this block
    is j * c_tile where j = pl.program_id(1).
    """
    tg, width = o_ref.shape
    j = pl.program_id(1)                       # class-tile index (0 on packed path)
    labels = t_ref[...]                        # (TG, pack) int32
    pos = jax.lax.broadcasted_iota(jnp.int32, (tg, width), 1)

    # Exactly one lane per sub-row matches; OR the pack compares together.
    onehot = pos == (labels[:, 0:1] - j * c_tile)
    for r in range(1, pack):
        target = labels[:, r:r + 1] + (r - j) * c_tile    # (TG, 1), broadcasts
        onehot = jnp.logical_or(onehot, pos == target)

    if smooth is None:
        o_ref[...] = onehot.astype(o_ref.dtype)
    else:
        on = jnp.float32(1.0 - smooth + smooth / n_classes)
        off = jnp.float32(smooth / n_classes)
        o_ref[...] = jnp.where(onehot, on, off).astype(o_ref.dtype)


def one_hot_pallas(target, n_classes, smooth=None, dtype=None, *,
                   block_bytes=2 * 1024 * 1024, max_class_tile=2048):
    """Pallas equivalent of OneHot.forward.

    target: integer array of any shape. Returns target.shape + (n_classes,).
    """
    target = jnp.asarray(target)
    orig_shape = target.shape
    flat = target.reshape(-1).astype(jnp.int32)
    n = flat.shape[0]
    C = int(n_classes)

    # Output dtype selection (see dtype note above).
    if dtype is not None:
        out_dtype = jnp.dtype(dtype)
    elif smooth is None:
        out_dtype = jnp.dtype(jnp.int32)
    else:
        out_dtype = jnp.dtype(jnp.float32)
    dtype_bytes = out_dtype.itemsize

    # ---- Lane-dense layout plan -------------------------------------------
    if C % 128 == 0:
        pack, c_pad = 1, C
    elif C < 128:
        pack = 128 // math.gcd(C, 128)          # pack * C == lcm(C, 128)
        c_pad = C
    else:
        pack = 1
        c_pad = pl.cdiv(C, 128) * 128           # pad classes up to lane multiple

    if pack == 1:
        c_tile = min(c_pad, max_class_tile)     # class-tile grid axis for huge C
        c_pad = pl.cdiv(c_pad, c_tile) * c_tile
        n_class_tiles = c_pad // c_tile
    else:
        c_tile = C
        n_class_tiles = 1
    lane_width = pack * c_tile                  # output block last dim, % 128 == 0

    # ---- Row tiling: ~block_bytes per output block, rows % 32 == 0 ---------
    groups = pl.cdiv(n, pack)                   # stored rows needed
    rows_target = max(32, (block_bytes // (lane_width * dtype_bytes)) // 32 * 32)
    # Cap at ~half the work (>=2 row blocks when there is enough work, for the
    # v7x megacore) and never over-pad tiny inputs.
    row_tile = min(rows_target, max(32, pl.cdiv(groups, 64) * 32))
    groups_pad = pl.cdiv(groups, row_tile) * row_tile

    total_labels = groups_pad * pack
    if total_labels != n:
        flat = jnp.pad(flat, (0, total_labels - n))   # pad with label 0; sliced off
    labels2d = flat.reshape(groups_pad, pack)         # contiguous full-row DMAs

    kernel = functools.partial(_onehot_kernel, n_classes=C, pack=pack,
                               c_tile=c_tile, smooth=smooth)

    out = pl.pallas_call(
        kernel,
        out_shape=jax.ShapeDtypeStruct((groups_pad, n_class_tiles * lane_width),
                                       out_dtype),
        grid=(groups_pad // row_tile, n_class_tiles),
        in_specs=[pl.BlockSpec((row_tile, pack), lambda i, j: (i, 0))],
        out_specs=pl.BlockSpec((row_tile, lane_width), lambda i, j: (i, j)),
        compiler_params=pltpu.CompilerParams(
            dimension_semantics=("parallel", "parallel"),
            vmem_limit_bytes=32 * 1024 * 1024,
        ),
    )(labels2d)

    if pack > 1:
        out = out.reshape(groups_pad * pack, C)[:n]
    else:
        out = out[:n, :C]
    return out.reshape(*orig_shape, C)


if __name__ == "__main__":
    key = jax.random.PRNGKey(0)
    k0, k1, k2 = jax.random.split(key, 3)

    n_classes = 16
    # Small label tensor: batch of 2 sequences of length 8.
    target = jax.random.randint(k0, (2, 8), minval=0, maxval=n_classes,
                                dtype=jnp.int32)

    # --- Plain one-hot (default int32, matches torch values) ---------------
    out_plain = jax.block_until_ready(one_hot_pallas(target, n_classes))
    ref_plain = jax.nn.one_hot(target, n_classes, dtype=jnp.int32)
    assert out_plain.shape == (2, 8, n_classes)
    assert jnp.array_equal(out_plain, ref_plain)

    # --- Smoothed, float32 --------------------------------------------------
    smooth = 0.1
    out_smooth = jax.block_until_ready(
        one_hot_pallas(target, n_classes, smooth=smooth, dtype=jnp.float32))
    ref_smooth = ((1.0 - smooth) * jax.nn.one_hot(target, n_classes,
                                                  dtype=jnp.float32)
                  + smooth / n_classes)
    assert out_smooth.shape == (2, 8, n_classes)
    assert jnp.allclose(out_smooth, ref_smooth, atol=1e-6)

    # --- Narrow-dtype (bandwidth-optimal) paths -----------------------------
    out_i8 = jax.block_until_ready(one_hot_pallas(target, n_classes,
                                                  dtype=jnp.int8))
    assert jnp.array_equal(out_i8.astype(jnp.int32), ref_plain)

    out_bf16 = jax.block_until_ready(
        one_hot_pallas(target, n_classes, smooth=smooth, dtype=jnp.bfloat16))
    assert jnp.allclose(out_bf16.astype(jnp.float32), ref_smooth, atol=1e-2)

    # --- Extra coverage: non-divisor small C (packed, pack=64) --------------
    t2 = jax.random.randint(k1, (3, 5), minval=0, maxval=10, dtype=jnp.int32)
    o2 = jax.block_until_ready(one_hot_pallas(t2, 10))
    assert jnp.array_equal(o2, jax.nn.one_hot(t2, 10, dtype=jnp.int32))

    # --- Extra coverage: large C with class-tile grid axis ------------------
    t3 = jax.random.randint(k2, (5,), minval=0, maxval=4096, dtype=jnp.int32)
    o3 = jax.block_until_ready(one_hot_pallas(t3, 4096))
    assert jnp.array_equal(o3, jax.nn.one_hot(t3, 4096, dtype=jnp.int32))

    print("KERNEL_OK")
</pallas_src>

<mosaic_0001>
module attributes {stable_mosaic.version = 11 : i64} {
  func.func @_onehot_kernel(%arg0: i32, %arg1: i32, %arg2: memref<32x8xi32, #tpu.memory_space<vmem>>, %arg3: memref<32x128xi32, #tpu.memory_space<vmem>>) attributes {dimension_semantics = [#tpu.dimension_semantics<parallel>, #tpu.dimension_semantics<parallel>], iteration_bounds = array<i64: 1, 1>, scalar_prefetch = 0 : i64, scratch_operands = 0 : i64, tpu.core_type = #tpu.core_type<tc>, window_params = [{transform_indices = @transform_0, window_bounds = array<i64: 32, 8>}, {transform_indices = @transform_1, window_bounds = array<i64: 32, 128>}]} {
    %c0 = arith.constant 0 : index
    %c0_0 = arith.constant 0 : index
    %0 = vector.load %arg2[%c0, %c0_0] : memref<32x8xi32, #tpu.memory_space<vmem>>, vector<32x8xi32>
    %1 = tpu.iota {dimensions = array<i32: 1>} : vector<32x128xi32>
    %2 = vector.extract_strided_slice %0 {offsets = [0, 0], sizes = [32, 1], strides = [1, 1]} : vector<32x8xi32> to vector<32x1xi32>
    %c16_i32 = arith.constant 16 : i32
    %3 = arith.muli %arg1, %c16_i32 : i32
    %4 = vector.broadcast %3 : i32 to vector<32x1xi32>
    %5 = arith.subi %2, %4 : vector<32x1xi32>
    %6 = vector.broadcast %5 : vector<32x1xi32> to vector<32x128xi32>
    %7 = arith.cmpi eq, %1, %6 : vector<32x128xi32>
    %8 = vector.extract_strided_slice %0 {offsets = [0, 1], sizes = [32, 1], strides = [1, 1]} : vector<32x8xi32> to vector<32x1xi32>
    %c1_i32 = arith.constant 1 : i32
    %9 = arith.subi %c1_i32, %arg1 : i32
    %c16_i32_1 = arith.constant 16 : i32
    %10 = arith.muli %9, %c16_i32_1 : i32
    %11 = vector.broadcast %10 : i32 to vector<32x1xi32>
    %12 = arith.addi %8, %11 : vector<32x1xi32>
    %13 = vector.broadcast %12 : vector<32x1xi32> to vector<32x128xi32>
    %14 = arith.cmpi eq, %1, %13 : vector<32x128xi32>
    %15 = arith.ori %7, %14 : vector<32x128xi1>
    %16 = vector.extract_strided_slice %0 {offsets = [0, 2], sizes = [32, 1], strides = [1, 1]} : vector<32x8xi32> to vector<32x1xi32>
    %c2_i32 = arith.constant 2 : i32
    %17 = arith.subi %c2_i32, %arg1 : i32
    %c16_i32_2 = arith.constant 16 : i32
    %18 = arith.muli %17, %c16_i32_2 : i32
    %19 = vector.broadcast %18 : i32 to vector<32x1xi32>
    %20 = arith.addi %16, %19 : vector<32x1xi32>
    %21 = vector.broadcast %20 : vector<32x1xi32> to vector<32x128xi32>
    %22 = arith.cmpi eq, %1, %21 : vector<32x128xi32>
    %23 = arith.ori %15, %22 : vector<32x128xi1>
    %24 = vector.extract_strided_slice %0 {offsets = [0, 3], sizes = [32, 1], strides = [1, 1]} : vector<32x8xi32> to vector<32x1xi32>
    %c3_i32 = arith.constant 3 : i32
    %25 = arith.subi %c3_i32, %arg1 : i32
    %c16_i32_3 = arith.constant 16 : i32
    %26 = arith.muli %25, %c16_i32_3 : i32
    %27 = vector.broadcast %26 : i32 to vector<32x1xi32>
    %28 = arith.addi %24, %27 : vector<32x1xi32>
    %29 = vector.broadcast %28 : vector<32x1xi32> to vector<32x128xi32>
    %30 = arith.cmpi eq, %1, %29 : vector<32x128xi32>
    %31 = arith.ori %23, %30 : vector<32x128xi1>
    %32 = vector.extract_strided_slice %0 {offsets = [0, 4], sizes = [32, 1], strides = [1, 1]} : vector<32x8xi32> to vector<32x1xi32>
    %c4_i32 = arith.constant 4 : i32
    %33 = arith.subi %c4_i32, %arg1 : i32
    %c16_i32_4 = arith.constant 16 : i32
    %34 = arith.muli %33, %c16_i32_4 : i32
    %35 = vector.broadcast %34 : i32 to vector<32x1xi32>
    %36 = arith.addi %32, %35 : vector<32x1xi32>
    %37 = vector.broadcast %36 : vector<32x1xi32> to vector<32x128xi32>
    %38 = arith.cmpi eq, %1, %37 : vector<32x128xi32>
    %39 = arith.ori %31, %38 : vector<32x128xi1>
    %40 = vector.extract_strided_slice %0 {offsets = [0, 5], sizes = [32, 1], strides = [1, 1]} : vector<32x8xi32> to vector<32x1xi32>
    %c5_i32 = arith.constant 5 : i32
    %41 = arith.subi %c5_i32, %arg1 : i32
    %c16_i32_5 = arith.constant 16 : i32
    %42 = arith.muli %41, %c16_i32_5 : i32
    %43 = vector.broadcast %42 : i32 to vector<32x1xi32>
    %44 = arith.addi %40, %43 : vector<32x1xi32>
    %45 = vector.broadcast %44 : vector<32x1xi32> to vector<32x128xi32>
    %46 = arith.cmpi eq, %1, %45 : vector<32x128xi32>
    %47 = arith.ori %39, %46 : vector<32x128xi1>
    %48 = vector.extract_strided_slice %0 {offsets = [0, 6], sizes = [32, 1], strides = [1, 1]} : vector<32x8xi32> to vector<32x1xi32>
    %c6_i32 = arith.constant 6 : i32
    %49 = arith.subi %c6_i32, %arg1 : i32
    %c16_i32_6 = arith.constant 16 : i32
    %50 = arith.muli %49, %c16_i32_6 : i32
    %51 = vector.broadcast %50 : i32 to vector<32x1xi32>
    %52 = arith.addi %48, %51 : vector<32x1xi32>
    %53 = vector.broadcast %52 : vector<32x1xi32> to vector<32x128xi32>
    %54 = arith.cmpi eq, %1, %53 : vector<32x128xi32>
    %55 = arith.ori %47, %54 : vector<32x128xi1>
    %56 = vector.extract_strided_slice %0 {offsets = [0, 7], sizes = [32, 1], strides = [1, 1]} : vector<32x8xi32> to vector<32x1xi32>
    %c7_i32 = arith.constant 7 : i32
    %57 = arith.subi %c7_i32, %arg1 : i32
    %c16_i32_7 = arith.constant 16 : i32
    %58 = arith.muli %57, %c16_i32_7 : i32
    %59 = vector.broadcast %58 : i32 to vector<32x1xi32>
    %60 = arith.addi %56, %59 : vector<32x1xi32>
    %61 = vector.broadcast %60 : vector<32x1xi32> to vector<32x128xi32>
    %62 = arith.cmpi eq, %1, %61 : vector<32x128xi32>
    %63 = arith.ori %55, %62 : vector<32x128xi1>
    %64 = arith.extui %63 : vector<32x128xi1> to vector<32x128xi32>
    %c0_8 = arith.constant 0 : index
    %c0_9 = arith.constant 0 : index
    %65 = vector.load %arg3[%c0_8, %c0_9] : memref<32x128xi32, #tpu.memory_space<vmem>>, vector<32x128xi32>
    tpu.vector_store %arg3[%c0_8, %c0_9], %64 {strides = array<i32>} : memref<32x128xi32, #tpu.memory_space<vmem>>, vector<32x128xi32>,
    return
  }
  func.func @transform_0(%arg0: i32, %arg1: i32) -> (i32, i32) {
    %c0_i32 = arith.constant 0 : i32
    %c0_i32_0 = arith.constant 0 : i32
    return %arg0, %c0_i32 : i32, i32
  }
  func.func @transform_1(%arg0: i32, %arg1: i32) -> (i32, i32) {
    %c0_i32 = arith.constant 0 : i32
    return %arg0, %arg1 : i32, i32
  }
}

</mosaic_0001>

<bundles_post_ra>
// kernel: tpu_custom_call.1
= control target key start
LH: loop header
LB: loop body
LE: loop exit
PB: predicated region body
PF: predicated region fallthrough
CT: control target
= control target key end

     0   :  { %v299_v2 = vmov 0   ;;  %s439_s0 = inlined_call_operand.vmem [shape: s32[32,8], index: 0, kind: input, shape index: {}]   ;;  %s440_s1 = inlined_call_operand.hbm [shape: s32[32,128], index: 1, kind: output, shape index: {}]  }
   0x1   :  { %v323_v0 = vld [vmem:[%s439_s0 + $0x10] sm:$0xff]  ;;  %v328_v1 = vld [vmem:[%s439_s0] sm:$0xff]  ;;  %262 = vset.pattern.permute.xlu1 %v299_v2  ;;  %261 = vset.pattern.permute.xlu0 %v299_v2 }
   0x2   :  { %28 = vperm.xlu1 %262, %v323_v0   ;;  %22 = vperm.xlu0 %261, %v328_v1  }
   0x3   :  { %6 = vsyncpa [#allocation3], 0  ;;  %v337_v3 = vld [vmem:[%s439_s0 + $0x18] sm:$0xff]  ;;  %v342_v4 = vld [vmem:[%s439_s0 + $0x8] sm:$0xff]  ;;  %v40_v6 = vadd.s32 16, %v328_v1  ;;  %v300_v7 = vmov 1   ;;  %v13_v59 = vlaneseq }
   0x4   :  { %v41_v5 = vadd.s32 16, %v342_v4  ;;  %v42_v8 = vadd.s32 16, %v323_v0  ;;  %v43_v9 = vadd.s32 16, %v337_v3  ;;  %v67_v10 = vadd.s32 32, %v328_v1  ;;  %s307_s0 = smov [#allocation2]  }
   0x5   :  { %v68_v11 = vadd.s32 32, %v342_v4  ;;  %v301_v12 = vmov 2   ;;  %v69_v13 = vadd.s32 32, %v323_v0  ;;  %v94_v14 = vadd.s32 48, %v328_v1  ;;  %s239_s14 = sshll.u32 %s307_s0, 4  ;;  %s240_s14 = int_to_ptr.vmem [resolvable:$true] %s239_s14 }
   0x6   :  { %31 = vperm.xlu1 %262, %v337_v3   ;;  %25 = vperm.xlu0 %261, %v342_v4   ;;  %v302_v15 = vmov 3   ;;  %v70_v16 = vadd.s32 32, %v337_v3  ;;  %v97_v17 = vadd.s32 48, %v337_v3  ;;  %v95_v18 = vadd.s32 48, %v342_v4  ;;  %s277_s15 = scalar_lea.vmem %s240_s14, 512  ;;  %p282_p1 = scmp.lt.s32.totalorder %s240_s14, %s240_s14 }
   0x7   :  { %v122_v19 = vadd.s32 64, %v342_v4  ;;  %v303_v20 = vmov 4   ;;  %v96_v21 = vadd.s32 48, %v323_v0  ;;  %v148_v22 = vadd.s32 80, %v328_v1  ;;  %p278_p0 = scmp.ne.s32.totalorder %s240_s14, %s277_s15  ;;  %p283_p2 = scmp.lt.s32.totalorder %s277_s15, %s277_s15 }
   0x8   :  { %v121_v23 = vadd.s32 64, %v328_v1  ;;  %v304_v24 = vmov 5   ;;  %v151_v25 = vadd.s32 80, %v337_v3  ;;  %v123_v26 = vadd.s32 64, %v323_v0 }
   0x9   :  { %v176_v27 = vadd.s32 96, %v342_v4  ;;  %v124_v28 = vadd.s32 64, %v337_v3  ;;  %v305_v29 = vmov 6   ;;  %v202_v30 = vadd.s32 112, %v328_v1  ;;  %p284_p3 = por %p283_p2, %p282_p1 }
   0xa   :  { %264 = vset.pattern.permute.xlu1 %v300_v7  ;;  %263 = vset.pattern.permute.xlu0 %v300_v7  ;;  %v149_v31 = vadd.s32 80, %v342_v4  ;;  %v306_v32 = vmov 7   ;;  %v205_v33 = vadd.s32 112, %v337_v3  ;;  %v150_v34 = vadd.s32 80, %v323_v0 }
   0xb   :  { %48 = vperm.xlu1 %264, %v41_v5   ;;  %45 = vperm.xlu0 %263, %v40_v6   ;;  %v175_v35 = vadd.s32 96, %v328_v1  ;;  %v177_v36 = vadd.s32 96, %v323_v0  ;;  %v178_v37 = vadd.s32 96, %v337_v3  ;;  %v203_v38 = vadd.s32 112, %v342_v4  ;;  %p285_p4 = pnand %p284_p3, %p278_p0 }
   0xc   :  { %v204_v39 = vadd.s32 112, %v323_v0  ;;  %v382_v62 = vand.u32 127, %v13_v59 }
   0xf   :  { %51 = vperm.xlu1 %264, %v42_v8   ;;  %54 = vperm.xlu0 %263, %v43_v9  }
  0x13   :  { %265 = vset.pattern.permute.xlu1 %v301_v12  ;;  %266 = vset.pattern.permute.xlu0 %v301_v12 }
  0x14   :  { %72 = vperm.xlu1 %265, %v67_v10   ;;  %75 = vperm.xlu0 %266, %v68_v11  }
  0x18   :  { %78 = vperm.xlu1 %265, %v69_v13   ;;  %267 = vset.pattern.permute.xlu0 %v302_v15 }
  0x19   :  { %99 = vperm.xlu0 %267, %v94_v14  }
  0x1c   :  { %81 = vperm.xlu1 %265, %v70_v16  }
  0x1d   :  { %108 = vperm.xlu0 %267, %v97_v17  }
  0x20   :  { %268 = vset.pattern.permute.xlu1 %v302_v15 }
  0x21   :  { %102 = vperm.xlu1 %268, %v95_v18   ;;  %270 = vset.pattern.permute.xlu0 %v303_v20 }
  0x22   :  { %129 = vperm.xlu0 %270, %v122_v19  }
  0x25   :  { %105 = vperm.xlu1 %268, %v96_v21  }
  0x26   :  { %271 = vset.pattern.permute.xlu0 %v304_v24 }
  0x27   :  { %153 = vperm.xlu0 %271, %v148_v22  }
  0x29   :  { %269 = vset.pattern.permute.xlu1 %v303_v20 }
  0x2a   :  { %126 = vperm.xlu1 %269, %v121_v23  }
  0x2b   :  { %162 = vperm.xlu0 %271, %v151_v25  }
  0x2e   :  { %132 = vperm.xlu1 %269, %v123_v26  }
  0x2f   :  { %274 = vset.pattern.permute.xlu0 %v305_v29 }
  0x30   :  { %183 = vperm.xlu0 %274, %v176_v27  }
  0x32   :  { %135 = vperm.xlu1 %269, %v124_v28  }
  0x34   :  { %275 = vset.pattern.permute.xlu0 %v306_v32 }
  0x35   :  { %207 = vperm.xlu0 %275, %v202_v30  }
  0x36   :  { %272 = vset.pattern.permute.xlu1 %v304_v24 }
  0x37   :  { %156 = vperm.xlu1 %272, %v149_v31  }
  0x39   :  { %216 = vperm.xlu0 %275, %v205_v33  }
  0x3b   :  { %159 = vperm.xlu1 %272, %v150_v34  }
  0x3f   :  { %273 = vset.pattern.permute.xlu1 %v305_v29 }
  0x40   :  { %180 = vperm.xlu1 %273, %v175_v35  }
  0x44   :  { %186 = vperm.xlu1 %273, %v177_v36  }
  0x48   :  { %189 = vperm.xlu1 %273, %v178_v37  }
  0x4c   :  { %276 = vset.pattern.permute.xlu1 %v306_v32 }
  0x4d   :  { %210 = vperm.xlu1 %276, %v203_v38  }
  0x51   :  { %213 = vperm.xlu1 %276, %v204_v39  }
  0x7d   :  { %v374_v40 = vpop.permute.xlu1 %28  ;;  %v23_v41 = vpop.permute.xlu0 %22 }
  0x7e   :  { %vm33_vm0 = vcmp.eq.s32.totalorder %v382_v62, %v23_v41 }
  0x81   :  { %v32_v42 = vpop.permute.xlu1 %31  ;;  %v26_v43 = vpop.permute.xlu0 %25 }
  0x82   :  { %vm34_vm2 = vcmp.eq.s32.totalorder %v382_v62, %v26_v43  ;;  %vm36_vm7 = vcmp.eq.s32.totalorder %v382_v62, %v32_v42 }
  0x86   :  { %v49_v44 = vpop.permute.xlu1 %48  ;;  %v46_v45 = vpop.permute.xlu0 %45 }
  0x87   :  { %vm56_vm1 = vcmp.eq.s32.totalorder %v382_v62, %v46_v45  ;;  %vm57_vm3 = vcmp.eq.s32.totalorder %v382_v62, %v49_v44 }
  0x88   :  { %vm60_vm5 = vmor %vm33_vm0, %vm56_vm1 }
  0x89   :  { %vm391_vm8 = vmor %vm34_vm2, %vm57_vm3 }
  0x8a   :  { %v52_v46 = vpop.permute.xlu1 %51  ;;  %v55_v47 = vpop.permute.xlu0 %54 }
  0x8b   :  { %vm59_vm4 = vcmp.eq.s32.totalorder %v382_v62, %v55_v47 }
  0x8c   :  { %vm63_vm10 = vmor %vm36_vm7, %vm59_vm4 }
  0x8f   :  { %v73_v48 = vpop.permute.xlu1 %72  ;;  %v76_v50 = vpop.permute.xlu0 %75 }
  0x90   :  { %vm83_vm6 = vcmp.eq.s32.totalorder %v382_v62, %v73_v48  ;;  %vm84_vm14 = vcmp.eq.s32.totalorder %v382_v62, %v76_v50 }
  0x91   :  { %vm87_vm12 = vmor %vm60_vm5, %vm83_vm6 }
  0x92   :  { %vm88_vm4 = vmor %vm391_vm8, %vm84_vm14 }
  0x93   :  { %v376_v49 = vpop.permute.xlu1 %78 }
  0x94   :  { %v100_v52 = vpop.permute.xlu0 %99 }
  0x95   :  { %vm110_vm9 = vcmp.eq.s32.totalorder %v382_v62, %v100_v52 }
  0x96   :  { %vm114_vm15 = vmor %vm87_vm12, %vm110_vm9 }
  0x97   :  { %v82_v51 = vpop.permute.xlu1 %81 }
  0x98   :  { %v109_v54 = vpop.permute.xlu0 %108  ;;  %vm86_vm11 = vcmp.eq.s32.totalorder %v382_v62, %v82_v51 }
  0x99   :  { %vm90_vm0 = vmor %vm63_vm10, %vm86_vm11  ;;  %vm113_vm1 = vcmp.eq.s32.totalorder %v382_v62, %v109_v54 }
  0x9a   :  { %vm403_vm7 = vmor %vm90_vm0, %vm113_vm1  ;;  %vm35_vm0 = vcmp.eq.s32.totalorder %v382_v62, %v374_v40 }
  0x9c   :  { %v103_v53 = vpop.permute.xlu1 %102 }
  0x9d   :  { %v130_v57 = vpop.permute.xlu0 %129  ;;  %vm111_vm6 = vcmp.eq.s32.totalorder %v382_v62, %v103_v53 }
  0x9e   :  { %vm115_vm8 = vmor %vm88_vm4, %vm111_vm6  ;;  %vm138_vm14 = vcmp.eq.s32.totalorder %v382_v62, %v130_v57 }
  0xa0   :  { %v378_v55 = vpop.permute.xlu1 %105 }
  0xa2   :  { %v154_v60 = vpop.permute.xlu0 %153 }
  0xa3   :  { %vm164_vm3 = vcmp.eq.s32.totalorder %v382_v62, %v154_v60 }
  0xa5   :  { %v127_v56 = vpop.permute.xlu1 %126 }
  0xa6   :  { %v163_v63 = vpop.permute.xlu0 %162  ;;  %vm137_vm13 = vcmp.eq.s32.totalorder %v382_v62, %v127_v56 }
  0xa7   :  { %vm141_vm2 = vmor %vm114_vm15, %vm137_vm13  ;;  %vm58_vm13 = vcmp.eq.s32.totalorder %v382_v62, %v52_v46 }
  0xa8   :  { %vm168_vm9 = vmor %vm141_vm2, %vm164_vm3  ;;  %vm167_vm2 = vcmp.eq.s32.totalorder %v382_v62, %v163_v63 }
  0xa9   :  { %v380_v58 = vpop.permute.xlu1 %132  ;;  %vm62_vm3 = vmor %vm35_vm0, %vm58_vm13 }
  0xab   :  { %v184_v3 = vpop.permute.xlu0 %183 }
  0xac   :  { %vm192_vm0 = vcmp.eq.s32.totalorder %v382_v62, %v184_v3 }
  0xad   :  { %v136_v61 = vpop.permute.xlu1 %135 }
  0xae   :  { %vm140_vm11 = vcmp.eq.s32.totalorder %v382_v62, %v136_v61 }
  0xaf   :  { %vm144_vm1 = vmor %vm403_vm7, %vm140_vm11  ;;  %vm112_vm7 = vcmp.eq.s32.totalorder %v382_v62, %v378_v55 }
  0xb0   :  { %v208_v5 = vpop.permute.xlu0 %207  ;;  %vm171_vm4 = vmor %vm144_vm1, %vm167_vm2  ;;  %vm139_vm1 = vcmp.eq.s32.totalorder %v382_v62, %v380_v58 }
  0xb1   :  { %vm218_vm5 = vcmp.eq.s32.totalorder %v382_v62, %v208_v5 }
  0xb2   :  { %v157_v0 = vpop.permute.xlu1 %156 }
  0xb4   :  { %v217_v10 = vpop.permute.xlu0 %216 }
  0xb5   :  { %vm221_vm6 = vcmp.eq.s32.totalorder %v382_v62, %v217_v10 }
  0xb6   :  { %v160_v4 = vpop.permute.xlu1 %159 }
  0xbb   :  { %v181_v7 = vpop.permute.xlu1 %180 }
  0xbc   :  { %vm191_vm10 = vcmp.eq.s32.totalorder %v382_v62, %v181_v7 }
  0xbd   :  { %vm195_vm12 = vmor %vm168_vm9, %vm191_vm10  ;;  %vm165_vm9 = vcmp.eq.s32.totalorder %v382_v62, %v157_v0  ;;  %vm85_vm10 = vcmp.eq.s32.totalorder %v382_v62, %v376_v49 }
  0xbe   :  { %vm222_vm15 = vmor %vm195_vm12, %vm218_vm5 }
  0xbf   :  { %v226_v8 = vsel %vm222_vm15, 1, %v299_v2  ;;  %v187_v9 = vpop.permute.xlu1 %186  ;;  %vm142_vm5 = vmor %vm115_vm8, %vm138_vm14 }
  0xc0   :  { %230 = vst [vmem:[#allocation2] sm:$0xff] %v226_v8  ;;  %vm169_vm12 = vmor %vm142_vm5, %vm165_vm9  ;;  %vm166_vm9 = vcmp.eq.s32.totalorder %v382_v62, %v160_v4 }
  0xc1   :  { %vm89_vm8 = vmor %vm62_vm3, %vm85_vm10 }
  0xc2   :  { %vm116_vm14 = vmor %vm89_vm8, %vm112_vm7 }
  0xc3   :  { %v190_v11 = vpop.permute.xlu1 %189  ;;  %vm196_vm2 = vmor %vm169_vm12, %vm192_vm0 }
  0xc4   :  { %vm194_vm15 = vcmp.eq.s32.totalorder %v382_v62, %v190_v11 }
  0xc5   :  { %vm198_vm11 = vmor %vm171_vm4, %vm194_vm15  ;;  %vm193_vm4 = vcmp.eq.s32.totalorder %v382_v62, %v187_v9 }
  0xc6   :  { %vm225_vm13 = vmor %vm198_vm11, %vm221_vm6 }
  0xc7   :  { %v229_v12 = vsel %vm225_vm13, 1, %v299_v2  ;;  %vm143_vm6 = vmor %vm116_vm14, %vm139_vm1 }
  0xc8   :  { %233 = vst [vmem:[#allocation2 + $0x18] sm:$0xff] %v229_v12  ;;  %v211_v13 = vpop.permute.xlu1 %210  ;;  %vm170_vm3 = vmor %vm143_vm6, %vm166_vm9 }
  0xc9   :  { %vm219_vm5 = vcmp.eq.s32.totalorder %v382_v62, %v211_v13  ;;  %vm197_vm10 = vmor %vm170_vm3, %vm193_vm4 }
  0xca   :  { %vm223_vm15 = vmor %vm196_vm2, %vm219_vm5 }
  0xcb   :  { %v227_v14 = vsel %vm223_vm15, 1, %v299_v2 }
  0xcc   :  { %231 = vst [vmem:[#allocation2 + $0x8] sm:$0xff] %v227_v14  ;;  %v214_v15 = vpop.permute.xlu1 %213 }
  0xcd   :  { %vm220_vm7 = vcmp.eq.s32.totalorder %v382_v62, %v214_v15 }
  0xce   :  { %vm224_vm11 = vmor %vm197_vm10, %vm220_vm7 }
  0xcf   :  { %v228_v16 = vsel %vm224_vm11, 1, %v299_v2 }
  0xd0   :  { %232 = vst [vmem:[#allocation2 + $0x10] sm:$0xff] %v228_v16 }
  0xd1   :  { %288 = shalt.err (!%p285_p4)
}
  0xd2   :  { %s308_s16 = smov 128   ;;  %s309_s17 = smov 8  }
  0xd3   :  { %245 = dma.vmem_to_hbm [thread:$0]  %s240_s14, 512, %s440_s1, [#allocation3], %s308_s16, %s308_s16, %s309_s17  }
  0xd4   :  { %297 = dma.done.wait [#allocation3], 512  }
  0xd5   :  { %298 = vsyncadd [#allocation3], 4294966784 }
  0xd6   :  { %249 = vsyncpa [#allocation3], 1 }

</bundles_post_ra>
